<compile_context>
chip_gen: v7x
topology: tpu7x:2x2x1
jax: 0.10.0
libtpu: 0.0.40
codegen_flags: <defaults>
</compile_context>

<pallas_src>
import math

import jax
import jax.numpy as jnp
from jax.experimental import pallas as pl
from jax.experimental.pallas import tpu as pltpu


# ----------------------- setup (== RoPE.__init__) ---------------------------


def make_rope_tables(shape, base=10000.0):
    """Build interleaved real rotation tables for RoPE.

    shape = (*channel_dims, feature_dim), mirroring RoPE.__init__.
    Returns cos_i, sin_s, each of shape (*channel_dims, feature_dim):
      cos_i[..., 2k] = cos_i[..., 2k+1] = cos(angle_k)
      sin_s[..., 2k] = -sin(angle_k),  sin_s[..., 2k+1] = +sin(angle_k)
    so that   out = x * cos_i + partner(x) * sin_s,
    partner[2k] = x[2k+1], partner[2k+1] = x[2k],
    reproduces the complex multiply exactly.
    """
    channel_dims, feature_dim = tuple(shape[:-1]), int(shape[-1])
    k_max = feature_dim // (2 * len(channel_dims))
    assert feature_dim % k_max == 0
    assert 2 * len(channel_dims) * k_max == feature_dim

    theta_ks = 1.0 / (base ** (jnp.arange(k_max, dtype=jnp.float32) / k_max))
    grids = jnp.meshgrid(
        *[jnp.arange(d, dtype=jnp.float32) for d in channel_dims], indexing="ij")
    angles = jnp.concatenate([g[..., None] * theta_ks for g in grids], axis=-1)
    cos, sin = jnp.cos(angles), jnp.sin(angles)          # (*cd, D//2)

    def interleave(a, b):   # (..., D//2) x 2 -> (..., D), pairwise interleave
        return jnp.stack([a, b], axis=-1).reshape(*a.shape[:-1], 2 * a.shape[-1])

    cos_i = interleave(cos, cos)
    sin_s = interleave(-sin, sin)
    return cos_i, sin_s


# ------------------------------- kernel -------------------------------------


def _rope_kernel(x_ref, cos_ref, sin_ref, o_ref):
    # Load in the input's native dtype; upcast in-register (v5e VPU is f32-only,
    # and this halves x's HBM read traffic for bf16 inputs).
    x = x_ref[...].astype(jnp.float32)                 # (TR, L) float32
    lanes = x.shape[-1]
    # Pairwise partner of every lane (x[2k] <-> x[2k+1]) via two XLU lane
    # rotations + a lane-parity select (XLU/VPU slots, not extra HBM traffic).
    # Wrap-around elements only ever land on the unselected parity branch.
    x_next = pltpu.roll(x, lanes - 1, axis=1)          # x_next[:, j] = x[:, j+1]
    x_prev = pltpu.roll(x, 1, axis=1)                  # x_prev[:, j] = x[:, j-1]
    lane = jax.lax.broadcasted_iota(jnp.int32, x.shape, 1)
    partner = jnp.where((lane & 1) == 0, x_next, x_prev)
    o_ref[...] = x * cos_ref[...] + partner * sin_ref[...]


# ------------------------------ tiling helpers -------------------------------


def _pick_lane_group(n_pos, d, max_lanes=2048):
    """Choose g (positions folded into the lane axis) so lanes = g*d.

    Prefers g*d % 128 == 0 (lane-dense, unmasked stores) with g dividing n_pos
    exactly; otherwise pads the position count minimally.  Returns (g, pad_pos).
    """
    g0 = 128 // math.gcd(d, 128)         # minimal g with (g*d) % 128 == 0
    if g0 * d > max_lanes:
        return 1, 0                      # D alone is already >= max_lanes
    best = None
    g = g0
    while g * d <= max_lanes:
        if n_pos % g == 0:
            best = g
        g += g0
    if best is not None:
        return best, 0
    return g0, (-n_pos) % g0             # pad positions to keep lane-dense rows


def _pick_row_tile(rows, lanes, max_rows=512, block_budget_bytes=2 * 1024 * 1024):
    """Row tile: multiple of 8 (or the full row count), divides the (possibly
    padded) row count, and keeps the f32 block within the VMEM budget.
    Returns (tr, pad_rows)."""
    bytes_per_row = lanes * 4
    cap = max(8, min(max_rows, block_budget_bytes // max(1, bytes_per_row)))
    if rows <= cap:
        return rows, 0                   # single row-block (full dim is always legal)
    best = None
    for t in range(8, cap + 1, 8):
        if rows % t == 0:
            best = t
    if best is not None:
        return best, 0
    rows_p = -(-rows // 8) * 8           # pad rows so an 8-aligned tile divides evenly
    best = 8
    for t in range(8, cap + 1, 8):
        if rows_p % t == 0:
            best = t
    return best, rows_p - rows


# ------------------------------ wrapper -------------------------------------


@jax.jit
def rope_forward(x, cos_i, sin_s):
    """Apply RoPE.  x: (..., *channel_dims, D); tables from make_rope_tables.

    Returns float32 (the module always casts to f32 before rotating)."""
    table_shape = cos_i.shape                       # (*channel_dims, D)
    n_spatial = len(table_shape) - 1
    d = int(table_shape[-1])
    assert x.shape[-(n_spatial + 1):] == table_shape, (x.shape, table_shape)

    orig_shape = x.shape
    n_pos = math.prod(table_shape[:-1])
    batch = math.prod(orig_shape[:-(n_spatial + 1)])

    # Native dtype in, f32 out (cast happens inside the kernel).
    x3 = x.reshape(batch, n_pos, d)
    cos2 = cos_i.astype(jnp.float32).reshape(n_pos, d)
    sin2 = sin_s.astype(jnp.float32).reshape(n_pos, d)

    # Fold positions into the lane axis -> lane-dense (multiple of 128) rows.
    g, pad_pos = _pick_lane_group(n_pos, d)
    lanes = g * d
    rows = (n_pos + pad_pos) // g
    tr, pad_rows = _pick_row_tile(rows, lanes)

    pad_total = pad_pos + pad_rows * g
    if pad_total:
        x3 = jnp.pad(x3, ((0, 0), (0, pad_total), (0, 0)))
        cos2 = jnp.pad(cos2, ((0, pad_total), (0, 0)))
        sin2 = jnp.pad(sin2, ((0, pad_total), (0, 0)))
    n_eff = n_pos + pad_total
    rows_eff = n_eff // g

    x3 = x3.reshape(batch, rows_eff, lanes)
    cos2 = cos2.reshape(rows_eff, lanes)
    sin2 = sin2.reshape(rows_eff, lanes)

    # Grid: row-tiles OUTER, batch INNER -> the table tiles (index only on r)
    # are unchanged across consecutive inner steps and are not re-DMA'd per
    # batch element.  Both axes "parallel" so v7x's two TensorCores split work.
    x_spec = pl.BlockSpec((None, tr, lanes), lambda r, b: (b, r, 0))
    o_spec = pl.BlockSpec((None, tr, lanes), lambda r, b: (b, r, 0))
    t_spec = pl.BlockSpec((tr, lanes), lambda r, b: (r, 0))

    out = pl.pallas_call(
        _rope_kernel,
        out_shape=jax.ShapeDtypeStruct((batch, rows_eff, lanes), jnp.float32),
        grid=(rows_eff // tr, batch),
        in_specs=[x_spec, t_spec, t_spec],
        out_specs=o_spec,
        compiler_params=pltpu.CompilerParams(
            dimension_semantics=("parallel", "parallel"),
            vmem_limit_bytes=32 * 1024 * 1024),
    )(x3, cos2, sin2)

    out = out.reshape(batch, n_eff, d)
    if pad_total:
        out = out[:, :n_pos, :]
    return out.reshape(orig_shape)


# -------------------- pure-JAX reference (mirrors PyTorch) ------------------


def rope_reference(x, shape, base=10000.0):
    channel_dims, feature_dim = tuple(shape[:-1]), int(shape[-1])
    k_max = feature_dim // (2 * len(channel_dims))
    theta_ks = 1.0 / (base ** (jnp.arange(k_max, dtype=jnp.float32) / k_max))
    grids = jnp.meshgrid(
        *[jnp.arange(d, dtype=jnp.float32) for d in channel_dims], indexing="ij")
    angles = jnp.concatenate([g[..., None] * theta_ks for g in grids], axis=-1)
    rotations = jnp.cos(angles) + 1j * jnp.sin(angles)        # (*cd, D//2)

    x = x.astype(jnp.float32)
    xp = x.reshape(*x.shape[:-1], -1, 2)
    xc = jax.lax.complex(xp[..., 0], xp[..., 1])              # (..., *cd, D//2)
    y = rotations * xc
    return jnp.stack([jnp.real(y), jnp.imag(y)], axis=-1).reshape(x.shape)


if __name__ == "__main__":
    key = jax.random.PRNGKey(0)

    # Small LamFormer-style 2D RoPE: shape = (H, W, D), batched input.
    B, H, W, D = 2, 16, 16, 32
    shape = (H, W, D)

    x = jax.random.normal(key, (B, H, W, D), dtype=jnp.float32)
    cos_i, sin_s = make_rope_tables(shape)      # register_buffer analogue

    out = jax.block_until_ready(rope_forward(x, cos_i, sin_s))
    ref = rope_reference(x, shape)
    assert out.shape == ref.shape and out.dtype == ref.dtype
    err = float(jnp.max(jnp.abs(out - ref)))
    assert err < 1e-4, f"f32 mismatch vs reference: {err}"

    # bf16 input path: kernel reads bf16, upcasts in-register, returns f32
    # (same semantics as the module's cast-to-f32).
    x_bf16 = x.astype(jnp.bfloat16)
    out_bf = jax.block_until_ready(rope_forward(x_bf16, cos_i, sin_s))
    ref_bf = rope_reference(x_bf16, shape)
    assert out_bf.dtype == jnp.float32
    err_bf = float(jnp.max(jnp.abs(out_bf - ref_bf)))
    assert err_bf < 1e-4, f"bf16 mismatch vs reference: {err_bf}"

    print("KERNEL_OK")
</pallas_src>

<mosaic_0001>
module attributes {stable_mosaic.version = 11 : i64} {
  func.func @_rope_kernel(%arg0: i32, %arg1: i32, %arg2: memref<1x4x2048xf32, #tpu.memory_space<vmem>>, %arg3: memref<4x2048xf32, #tpu.memory_space<vmem>>, %arg4: memref<4x2048xf32, #tpu.memory_space<vmem>>, %arg5: memref<1x4x2048xf32, #tpu.memory_space<vmem>>) attributes {dimension_semantics = [#tpu.dimension_semantics<parallel>, #tpu.dimension_semantics<parallel>], iteration_bounds = array<i64: 1, 2>, scalar_prefetch = 0 : i64, scratch_operands = 0 : i64, tpu.core_type = #tpu.core_type<tc>, window_params = [{transform_indices = @transform_0, window_bounds = array<i64: 1, 4, 2048>}, {transform_indices = @transform_1, window_bounds = array<i64: 4, 2048>}, {transform_indices = @transform_2, window_bounds = array<i64: 4, 2048>}, {transform_indices = @transform_3, window_bounds = array<i64: 1, 4, 2048>}]} {
    %c0 = arith.constant 0 : index
    %c0_0 = arith.constant 0 : index
    %c0_1 = arith.constant 0 : index
    %0 = vector.load %arg2[%c0, %c0_0, %c0_1] : memref<1x4x2048xf32, #tpu.memory_space<vmem>>, vector<1x4x2048xf32>
    %1 = vector.shape_cast %0 : vector<1x4x2048xf32> to vector<4x2048xf32>
    %c2047_i32 = arith.constant 2047 : i32
    %2 = tpu.dynamic_rotate %1 by %c2047_i32 dim 1 : vector<4x2048xf32>, i32 -> vector<4x2048xf32>
    %c1_i32 = arith.constant 1 : i32
    %3 = tpu.dynamic_rotate %1 by %c1_i32 dim 1 : vector<4x2048xf32>, i32 -> vector<4x2048xf32>
    %4 = tpu.iota {dimensions = array<i32: 1>} : vector<4x2048xi32>
    %c1_i32_2 = arith.constant 1 : i32
    %5 = vector.broadcast %c1_i32_2 : i32 to vector<4x2048xi32>
    %6 = arith.andi %4, %5 : vector<4x2048xi32>
    %c0_i32 = arith.constant 0 : i32
    %7 = vector.broadcast %c0_i32 : i32 to vector<4x2048xi32>
    %8 = arith.cmpi eq, %6, %7 : vector<4x2048xi32>
    %9 = arith.select %8, %2, %3 : vector<4x2048xi1>, vector<4x2048xf32>
    %c0_3 = arith.constant 0 : index
    %c0_4 = arith.constant 0 : index
    %10 = vector.load %arg3[%c0_3, %c0_4] : memref<4x2048xf32, #tpu.memory_space<vmem>>, vector<4x2048xf32>
    %11 = arith.mulf %1, %10 : vector<4x2048xf32>
    %c0_5 = arith.constant 0 : index
    %c0_6 = arith.constant 0 : index
    %12 = vector.load %arg4[%c0_5, %c0_6] : memref<4x2048xf32, #tpu.memory_space<vmem>>, vector<4x2048xf32>
    %13 = arith.mulf %9, %12 : vector<4x2048xf32>
    %14 = arith.addf %11, %13 : vector<4x2048xf32>
    %c0_7 = arith.constant 0 : index
    %c0_8 = arith.constant 0 : index
    %c0_9 = arith.constant 0 : index
    %15 = vector.load %arg5[%c0_7, %c0_8, %c0_9] : memref<1x4x2048xf32, #tpu.memory_space<vmem>>, vector<1x4x2048xf32>
    %16 = vector.shape_cast %15 : vector<1x4x2048xf32> to vector<4x2048xf32>
    %17 = vector.shape_cast %14 : vector<4x2048xf32> to vector<1x4x2048xf32>
    tpu.vector_store %arg5[%c0_7, %c0_8, %c0_9], %17 {strides = array<i32>} : memref<1x4x2048xf32, #tpu.memory_space<vmem>>, vector<1x4x2048xf32>,
    return
  }
  func.func @transform_0(%arg0: i32, %arg1: i32) -> (i32, i32, i32) {
    %c0_i32 = arith.constant 0 : i32
    %c0_i32_0 = arith.constant 0 : i32
    return %arg1, %arg0, %c0_i32 : i32, i32, i32
  }
  func.func @transform_1(%arg0: i32, %arg1: i32) -> (i32, i32) {
    %c0_i32 = arith.constant 0 : i32
    %c0_i32_0 = arith.constant 0 : i32
    return %arg0, %c0_i32 : i32, i32
  }
  func.func @transform_2(%arg0: i32, %arg1: i32) -> (i32, i32) {
    %c0_i32 = arith.constant 0 : i32
    %c0_i32_0 = arith.constant 0 : i32
    return %arg0, %c0_i32 : i32, i32
  }
  func.func @transform_3(%arg0: i32, %arg1: i32) -> (i32, i32, i32) {
    %c0_i32 = arith.constant 0 : i32
    %c0_i32_0 = arith.constant 0 : i32
    return %arg1, %arg0, %c0_i32 : i32, i32, i32
  }
}

</mosaic_0001>

<bundles_post_ra>
// kernel: rope_forward.1
= control target key start
LH: loop header
LB: loop body
LE: loop exit
PB: predicated region body
PF: predicated region fallthrough
CT: control target
= control target key end

     0   :  { %s780_s12 = smov 0   ;;  %s782_s13 = smov 0   ;;  %s1206_s0 = inlined_call_operand.vmem [shape: f32[2,4,2048], index: 0, kind: input, shape index: {}]   ;;  %s1207_s1 = inlined_call_operand.vmem [shape: f32[4,2048], index: 1, kind: input, shape index: {}]   ;;  %s1208_s2 = inlined_call_operand.vmem [shape: f32[4,2048], index: 2, kind: input, shape index: {}]   ;;  %s1209_s3 = inlined_call_operand.vmem [shape: f32[2,4,2048], index: 3, kind: output, shape index: {}]  }
   0x1   :  { %s784_s14 = smov 0  }
   0x2 LB: > { %s22_s15 = sadd.s32 1, %s752_s13  ;;  %p683_p0 = scmp.ge.s32.totalorder %s756_s14, 1  ;;  %s756_s14 = sphi %s784_s14, %s13_s14   ;;  %s752_s13 = sphi %s782_s13, %s1243_s13   ;;  %s748_s12 = sphi %s780_s12, %s1242_s12  }
   0x3   : > { %p23_p1 = scmp.ge.s32.totalorder %s22_s15, 2  ;;  %p177_p2 = scmp.lt.s32.totalorder %s756_s14, 3 }
   0x5   : > { %s1245_s15 = smov (%p23_p1, %s22_s15), 0  ;;  %p178_p3 = pnand %p683_p0, %p177_p2 }
   0x6   : > { %p219_p4 = scmp.lt.s32.totalorder (!%p178_p3), %s748_s12, 1  ;;  %s758_s20 = smov (!%p178_p3), 127   ;;  %v311_v26 = vlaneseq (!%p178_p3)  ;;  %v443_v40 = vld [vmem:[%s1207_s1 + $0x8] sm:$0xff] (!%p178_p3)  ;;  %v442_v42 = vld [vmem:[%s1207_s1] sm:$0xff] (!%p178_p3)  ;;  %v444_v43 = vld [vmem:[%s1207_s1 + $0x10] sm:$0xff] (!%p178_p3) }
   0x7   : > { %181 = sbr.rel (%p178_p3) target bundleno = 202 (0xca), region = 32  ;;  %s759_s21 = smov (!%p178_p3), 1   ;;  %v908_v46 = vld [vmem:[%s1208_s2] sm:$0xff] (!%p178_p3)  ;;  %v459_v52 = vld [vmem:[%s1208_s2 + $0x8] sm:$0xff] (!%p178_p3)  ;;  %v460_v53 = vld [vmem:[%s1208_s2 + $0x10] sm:$0xff] (!%p178_p3) }
   0x8   : > { %v876_v29 = vand.u32 (!%p178_p3), 127, %v311_v26  ;;  %v474_v60 = vcombine.high (!%p178_p3), %v908_v46, %v908_v46 }
   0xa   : > { %v380_v32 = vadd.s32 (!%p178_p3), 256, %v876_v29  ;;  %v381_v33 = vadd.s32 (!%p178_p3), 384, %v876_v29  ;;  %v382_v34 = vadd.s32 (!%p178_p3), 512, %v876_v29  ;;  %v383_v35 = vadd.s32 (!%p178_p3), 640, %v876_v29 }
   0xb   : > { %v384_v38 = vadd.s32 (!%p178_p3), 768, %v876_v29  ;;  %v385_v39 = vadd.s32 (!%p178_p3), 896, %v876_v29  ;;  %v896_v41 = vadd.s32 (!%p178_p3), 128, %v876_v29  ;;  %vm313_vm0 = vcmp.lt.s32.totalorder (!%p178_p3), %v876_v29, 127 }
   0xc   : > { %v396_v44 = vand.u32 (!%p178_p3), 1, %v380_v32  ;;  %v397_v45 = vand.u32 (!%p178_p3), 1, %v381_v33  ;;  %v398_v47 = vand.u32 (!%p178_p3), 1, %v382_v34  ;;  %v399_v48 = vand.u32 (!%p178_p3), 1, %v383_v35 }
   0xd   : > { %v400_v54 = vand.u32 (!%p178_p3), 1, %v384_v38  ;;  %v401_v55 = vand.u32 (!%p178_p3), 1, %v385_v39  ;;  %v386_v56 = vadd.s32 (!%p178_p3), 1024, %v876_v29  ;;  %vm362_vm1 = vcmp.lt.s32.totalorder (!%p178_p3), %v876_v29, 1  ;;  %v978_v38 = vld [vmem:[%s1208_s2 + $0x20] sm:$0xff] (!%p178_p3) }
   0xe   : > { %s1247_s12 = smov (!%p219_p4, %s748_s12), 1  ;;  %v395_v59 = vand.u32 1, %v896_v41  ;;  %vm932_vm2 = vcmp.eq.s32.totalorder %v396_v44, 0  ;;  %vm936_vm3 = vcmp.eq.s32.totalorder %v397_v45, 0  ;;  %v387_v63 = vadd.s32 1152, %v876_v29 }
   0xf   : > { %s690_s16 = sshll.u32 %s1247_s12, 6  ;;  %vm941_vm4 = vcmp.eq.s32.totalorder %v398_v47, 0  ;;  %vm945_vm5 = vcmp.eq.s32.totalorder %v399_v48, 0  ;;  %vm952_vm6 = vcmp.eq.s32.totalorder %v400_v54, 0  ;;  %vm956_vm7 = vcmp.eq.s32.totalorder %v401_v55, 0 }
  0x10   : > { %s227_s19 = scalar_lea.vmem %s1206_s0, %s690_s16  ;;  %v388_v26 = vadd.s32 1280, %v876_v29  ;;  %v389_v47 = vadd.s32 1408, %v876_v29  ;;  %v478_v61 = vcombine.high %v978_v38, %v978_v38  ;;  %s1012_s22 = scalar_lea.vmem %s1209_s3, %s690_s16  ;;  %vm1063_vm12 = vcmp.eq.s32.totalorder %v395_v59, 0 }
  0x11   : > { %v806_v0 = vld [vmem:[%s227_s19 + $0x8] sm:$0xff]  ;;  %v808_v1 = vld [vmem:[%s227_s19] sm:$0xff]  ;;  %v814_v3 = vld [vmem:[%s227_s19 + $0x10] sm:$0xff] }
  0x12   : > { %283 = vrot.lane.b32.xlu1 %v806_v0, %s758_s20  ;;  %279 = vrot.lane.b32.xlu0 %v808_v1, %s758_s20  ;;  %v264_v2 = vcombine.high %v806_v0, %v806_v0  ;;  %v265_v4 = vcombine.high %v814_v3, %v814_v3  ;;  %v263_v5 = vcombine.high %v808_v1, %v808_v1  ;;  %v821_v6 = vld [vmem:[%s227_s19 + $0x18] sm:$0xff]  ;;  %v825_v8 = vld [vmem:[%s227_s19 + $0x20] sm:$0xff] }
  0x13   : > { %v266_v7 = vcombine.high %v821_v6, %v821_v6  ;;  %v267_v9 = vcombine.high %v825_v8, %v825_v8  ;;  %v830_v10 = vld [vmem:[%s227_s19 + $0x28] sm:$0xff]  ;;  %v835_v12 = vld [vmem:[%s227_s19 + $0x30] sm:$0xff]  ;;  %v840_v14 = vld [vmem:[%s227_s19 + $0x38] sm:$0xff]  ;;  %v451_v49 = vmul.f32 %v443_v40, %v806_v0  ;;  %v923_v57 = vmul.f32 %v442_v42, %v808_v1 }
  0x14   : > { %v268_v11 = vcombine.high %v830_v10, %v830_v10  ;;  %v269_v13 = vcombine.high %v835_v12, %v835_v12  ;;  %v270_v15 = vcombine.high %v840_v14, %v840_v14  ;;  %v926_v58 = vmul.f32 %v444_v43, %v814_v3 }
  0x16   : > { %285 = vrot.lane.b32.xlu1 %v264_v2, %s758_s20  ;;  %287 = vrot.lane.b32.xlu0 %v814_v3, %s758_s20 }
  0x1a   : > { %289 = vrot.lane.b32.xlu1 %v265_v4, %s758_s20  ;;  %281 = vrot.lane.b32.xlu0 %v263_v5, %s758_s20 }
  0x1e   : > { %293 = vrot.lane.b32.xlu1 %v266_v7, %s758_s20  ;;  %291 = vrot.lane.b32.xlu0 %v821_v6, %s758_s20 }
  0x22   : > { %297 = vrot.lane.b32.xlu1 %v267_v9, %s758_s20  ;;  %295 = vrot.lane.b32.xlu0 %v825_v8, %s758_s20 }
  0x26   : > { %301 = vrot.lane.b32.xlu1 %v268_v11, %s758_s20  ;;  %299 = vrot.lane.b32.xlu0 %v830_v10, %s758_s20 }
  0x2a   : > { %305 = vrot.lane.b32.xlu1 %v269_v13, %s758_s20  ;;  %303 = vrot.lane.b32.xlu0 %v835_v12, %s758_s20 }
  0x2e   : > { %309 = vrot.lane.b32.xlu1 %v270_v15, %s758_s20  ;;  %307 = vrot.lane.b32.xlu0 %v840_v14, %s758_s20 }
  0x32   : > { %332 = vrot.lane.b32.xlu1 %v263_v5, %s759_s21  ;;  %330 = vrot.lane.b32.xlu0 %v808_v1, %s759_s21 }
  0x36   : > { %336 = vrot.lane.b32.xlu1 %v264_v2, %s759_s21  ;;  %334 = vrot.lane.b32.xlu0 %v806_v0, %s759_s21  ;;  %v475_v0 = vcombine.high %v459_v52, %v459_v52 }
  0x3a   : > { %340 = vrot.lane.b32.xlu1 %v265_v4, %s759_s21  ;;  %338 = vrot.lane.b32.xlu0 %v814_v3, %s759_s21  ;;  %v476_v3 = vcombine.high %v460_v53, %v460_v53  ;;  %v461_v4 = vld [vmem:[%s1208_s2 + $0x18] sm:$0xff] }
  0x3b   : > { %v477_v42 = vcombine.high %v461_v4, %v461_v4 }
  0x3e   : > { %344 = vrot.lane.b32.xlu1 %v266_v7, %s759_s21  ;;  %342 = vrot.lane.b32.xlu0 %v821_v6, %s759_s21 }
  0x42   : > { %348 = vrot.lane.b32.xlu1 %v267_v9, %s759_s21  ;;  %346 = vrot.lane.b32.xlu0 %v825_v8, %s759_s21 }
  0x46   : > { %352 = vrot.lane.b32.xlu1 %v268_v11, %s759_s21  ;;  %350 = vrot.lane.b32.xlu0 %v830_v10, %s759_s21 }
  0x4a   : > { %356 = vrot.lane.b32.xlu1 %v269_v13, %s759_s21  ;;  %354 = vrot.lane.b32.xlu0 %v835_v12, %s759_s21  ;;  %v445_v13 = vld [vmem:[%s1207_s1 + $0x18] sm:$0xff] }
  0x4b   : > { %v453_v45 = vmul.f32 %v445_v13, %v821_v6 }
  0x4e   : > { %360 = vrot.lane.b32.xlu1 %v270_v15, %s759_s21  ;;  %358 = vrot.lane.b32.xlu0 %v840_v14, %s759_s21  ;;  %v402_v15 = vand.u32 1, %v386_v56  ;;  %v394_v56 = vand.u32 1, %v876_v29 }
  0x50   : > { %vm990_vm8 = vcmp.eq.s32.totalorder %v402_v15, 0  ;;  %vm1120_vm15 = vcmp.eq.s32.totalorder %v394_v56, 0 }
  0x84   : > { %v854_v16 = vpop.permute.xlu1 %283  ;;  %v856_v17 = vpop.permute.xlu0 %279 }
  0x88   : > { %v286_v18 = vpop.permute.xlu1 %285  ;;  %v858_v19 = vpop.permute.xlu0 %287 }
  0x89   : > { %v326_v32 = vsel %vm313_vm0, %v854_v16, %v286_v18  ;;  %v325_v33 = vsel %vm313_vm0, %v286_v18, %v858_v19  ;;  %v403_v18 = vand.u32 1, %v387_v63 }
  0x8b   : > { %vm1018_vm9 = vcmp.eq.s32.totalorder %v403_v18, 0 }
  0x8c   : > { %v860_v20 = vpop.permute.xlu1 %289  ;;  %v862_v21 = vpop.permute.xlu0 %281 }
  0x8d   : > { %v324_v48 = vsel %vm313_vm0, %v858_v19, %v860_v20 }
  0x90   : > { %v864_v22 = vpop.permute.xlu1 %293  ;;  %v866_v23 = vpop.permute.xlu0 %291 }
  0x91   : > { %v323_v6 = vsel %vm313_vm0, %v860_v20, %v866_v23  ;;  %v322_v1 = vsel %vm313_vm0, %v866_v23, %v864_v22 }
  0x94   : > { %v868_v24 = vpop.permute.xlu1 %297  ;;  %v870_v25 = vpop.permute.xlu0 %295 }
  0x95   : > { %v320_v9 = vsel %vm313_vm0, %v870_v25, %v868_v24 }
  0x98   : > { %v872_v27 = vpop.permute.xlu1 %301  ;;  %v874_v28 = vpop.permute.xlu0 %299 }
  0x99   : > { %v318_v13 = vsel %vm313_vm0, %v874_v28, %v872_v27 }
  0x9c   : > { %v878_v30 = vpop.permute.xlu1 %305  ;;  %v880_v31 = vpop.permute.xlu0 %303 }
  0xa0   : > { %v886_v36 = vpop.permute.xlu1 %309  ;;  %v888_v37 = vpop.permute.xlu0 %307 }
  0xa4   : > { %v911_v50 = vpop.permute.xlu1 %332  ;;  %v913_v51 = vpop.permute.xlu0 %330 }
  0xa8   : > { %v337_v5 = vpop.permute.xlu1 %336  ;;  %v335_v7 = vpop.permute.xlu0 %334 }
  0xa9   : > { %v375_v34 = vsel %vm362_vm1, %v335_v7, %v337_v5  ;;  %v376_v35 = vsel %vm362_vm1, %v911_v50, %v335_v7 }
  0xaa   : > { %v428_v39 = vsel %vm932_vm2, %v326_v32, %v376_v35  ;;  %v429_v40 = vsel %vm936_vm3, %v325_v33, %v375_v34  ;;  %v405_v33 = vand.u32 1, %v389_v47  ;;  %v463_v34 = vld [vmem:[%s1208_s2 + $0x28] sm:$0xff] }
  0xab   : > { %v492_v43 = vmul.f32 %v459_v52, %v428_v39  ;;  %v493_v44 = vmul.f32 %v475_v0, %v429_v40  ;;  %v404_v52 = vand.u32 1, %v388_v26  ;;  %v446_v0 = vld [vmem:[%s1207_s1 + $0x20] sm:$0xff]  ;;  %v316_v40 = vsel %vm313_vm0, %v880_v31, %v878_v30 }
  0xac   : > { %v341_v54 = vpop.permute.xlu1 %340  ;;  %v339_v55 = vpop.permute.xlu0 %338  ;;  %v454_v39 = vmul.f32 %v446_v0, %v825_v8  ;;  %v447_v8 = vld [vmem:[%s1207_s1 + $0x28] sm:$0xff]  ;;  %vm1053_vm11 = vcmp.eq.s32.totalorder %v405_v33, 0 }
  0xad   : > { %v523_v62 = vcombine.low %v492_v43, %v493_v44  ;;  %v373_v63 = vsel %vm362_vm1, %v339_v55, %v341_v54  ;;  %v374_v19 = vsel %vm362_vm1, %v337_v5, %v339_v55  ;;  %v390_v5 = vadd.s32 1536, %v876_v29 }
  0xae   : > { %v430_v20 = vsel %vm941_vm4, %v324_v48, %v374_v19  ;;  %v431_v7 = vsel %vm945_vm5, %v323_v6, %v373_v63  ;;  %vm1031_vm10 = vcmp.eq.s32.totalorder %v404_v52, 0  ;;  %v319_v63 = vsel %vm313_vm0, %v868_v24, %v874_v28 }
  0xaf   : > { %v539_v15 = vadd.f32 %v523_v62, %v451_v49  ;;  %v494_v26 = vmul.f32 %v460_v53, %v430_v20  ;;  %v495_v32 = vmul.f32 %v476_v3, %v431_v7  ;;  %v391_v49 = vadd.s32 1664, %v876_v29 }
  0xb0   : > { %v345_v2 = vpop.permute.xlu1 %344  ;;  %v343_v35 = vpop.permute.xlu0 %342  ;;  %v321_v53 = vsel %vm313_vm0, %v864_v22, %v870_v25  ;;  %v479_v22 = vcombine.high %v463_v34, %v463_v34  ;;  %v406_v47 = vand.u32 1, %v390_v5  ;;  %v393_v20 = vadd.s32 1920, %v876_v29 }
  0xb1   : > { %547 = vst [vmem:[%s1012_s22 + $0x8] sm:$0xff] %v539_v15  ;;  %v524_v3 = vcombine.low %v494_v26, %v495_v32  ;;  %v371_v23 = vsel %vm362_vm1, %v343_v35, %v345_v2  ;;  %v372_v18 = vsel %vm362_vm1, %v341_v54, %v343_v35  ;;  %v448_v26 = vld [vmem:[%s1207_s1 + $0x30] sm:$0xff]  ;;  %v327_v6 = vsel %vm313_vm0, %v862_v21, %v854_v16 }
  0xb2   : > { %v432_v43 = vsel %vm952_vm6, %v322_v1, %v372_v18  ;;  %v433_v44 = vsel %vm956_vm7, %v321_v53, %v371_v23  ;;  %vm1085_vm13 = vcmp.eq.s32.totalorder %v406_v47, 0  ;;  %v409_v23 = vand.u32 1, %v393_v20 }
  0xb3   : > { %v540_v48 = vadd.f32 %v524_v3, %v926_v58  ;;  %v496_v55 = vmul.f32 %v461_v4, %v432_v43  ;;  %v497_v52 = vmul.f32 %v477_v42, %v433_v44  ;;  %v455_v58 = vmul.f32 %v447_v8, %v830_v10  ;;  %v464_v10 = vld [vmem:[%s1208_s2 + $0x30] sm:$0xff] }
  0xb4   : > { %v349_v54 = vpop.permute.xlu1 %348  ;;  %v347_v62 = vpop.permute.xlu0 %346  ;;  %v407_v4 = vand.u32 1, %v391_v49  ;;  %v392_v42 = vadd.s32 1792, %v876_v29  ;;  %v465_v49 = vld [vmem:[%s1208_s2 + $0x38] sm:$0xff]  ;;  %v377_v47 = vsel %vm362_vm1, %v913_v51, %v911_v50  ;;  %vm1156_vm3 = vcmp.eq.s32.totalorder %v409_v23, 0 }
  0xb5   : > { %548 = vst [vmem:[%s1012_s22 + $0x10] sm:$0xff] %v540_v48  ;;  %v525_v25 = vcombine.low %v496_v55, %v497_v52  ;;  %v369_v41 = vsel %vm362_vm1, %v347_v62, %v349_v54  ;;  %v370_v59 = vsel %vm362_vm1, %v345_v2, %v347_v62  ;;  %v449_v52 = vld [vmem:[%s1207_s1 + $0x38] sm:$0xff]  ;;  %v427_v62 = vsel %vm1063_vm12, %v327_v6, %v377_v47 }
  0xb6   : > { %v434_v19 = vsel %vm990_vm8, %v320_v9, %v370_v59  ;;  %v435_v0 = vsel %vm1018_vm9, %v319_v63, %v369_v41  ;;  %vm1099_vm14 = vcmp.eq.s32.totalorder %v407_v4, 0  ;;  %v328_v16 = vsel %vm313_vm0, %v856_v17, %v862_v21 }
  0xb7   : > { %v541_v7 = vadd.f32 %v525_v25, %v453_v45  ;;  %v498_v5 = vmul.f32 %v978_v38, %v434_v19  ;;  %v499_v15 = vmul.f32 %v478_v61, %v435_v0  ;;  %v480_v45 = vcombine.high %v464_v10, %v464_v10 }
  0xb8   : > { %v353_v32 = vpop.permute.xlu1 %352  ;;  %v351_v33 = vpop.permute.xlu0 %350  ;;  %v408_v38 = vand.u32 1, %v392_v42  ;;  %v317_v61 = vsel %vm313_vm0, %v872_v27, %v880_v31  ;;  %v456_v27 = vmul.f32 %v448_v26, %v835_v12  ;;  %v329_v25 = vsel %vm313_vm0, %v886_v36, %v856_v17 }
  0xb9   : > { %549 = vst [vmem:[%s1012_s22 + $0x18] sm:$0xff] %v541_v7  ;;  %v526_v2 = vcombine.low %v498_v5, %v499_v15  ;;  %v367_v35 = vsel %vm362_vm1, %v351_v33, %v353_v32  ;;  %v368_v28 = vsel %vm362_vm1, %v349_v54, %v351_v33  ;;  %v314_v41 = vsel %vm313_vm0, %v888_v37, %v886_v36 }
  0xba   : > { %v436_v53 = vsel %vm1031_vm10, %v318_v13, %v368_v28  ;;  %v437_v3 = vsel %vm1053_vm11, %v317_v61, %v367_v35  ;;  %vm1132_vm2 = vcmp.eq.s32.totalorder %v408_v38, 0  ;;  %v491_v36 = vmul.f32 %v474_v60, %v427_v62 }
  0xbb   : > { %v542_v18 = vadd.f32 %v526_v2, %v454_v39  ;;  %v500_v8 = vmul.f32 %v463_v34, %v436_v53  ;;  %v501_v43 = vmul.f32 %v479_v22, %v437_v3  ;;  %v481_v34 = vcombine.high %v465_v49, %v465_v49 }
  0xbc   : > { %v357_v48 = vpop.permute.xlu1 %356  ;;  %v355_v12 = vpop.permute.xlu0 %354  ;;  %v315_v22 = vsel %vm313_vm0, %v878_v30, %v888_v37 }
  0xbd   : > { %550 = vst [vmem:[%s1012_s22 + $0x20] sm:$0xff] %v542_v18  ;;  %v527_v55 = vcombine.low %v500_v8, %v501_v43  ;;  %v365_v31 = vsel %vm362_vm1, %v355_v12, %v357_v48  ;;  %v366_v50 = vsel %vm362_vm1, %v353_v32, %v355_v12 }
  0xbe   : > { %v438_v30 = vsel %vm1085_vm13, %v316_v40, %v366_v50  ;;  %v439_v9 = vsel %vm1099_vm14, %v315_v22, %v365_v31 }
  0xbf   : > { %v543_v4 = vadd.f32 %v527_v55, %v455_v58  ;;  %v502_v42 = vmul.f32 %v464_v10, %v438_v30  ;;  %v503_v63 = vmul.f32 %v480_v45, %v439_v9  ;;  %v457_v58 = vmul.f32 %v449_v52, %v840_v14 }
  0xc0   : > { %v361_v11 = vpop.permute.xlu1 %360  ;;  %v359_v59 = vpop.permute.xlu0 %358 }
  0xc1   : > { %551 = vst [vmem:[%s1012_s22 + $0x28] sm:$0xff] %v543_v4  ;;  %v528_v10 = vcombine.low %v502_v42, %v503_v63  ;;  %v378_v21 = vsel %vm362_vm1, %v361_v11, %v913_v51  ;;  %v363_v17 = vsel %vm362_vm1, %v359_v59, %v361_v11  ;;  %v364_v19 = vsel %vm362_vm1, %v357_v48, %v359_v59 }
  0xc2   : > { %v426_v14 = vsel %vm1120_vm15, %v328_v16, %v378_v21  ;;  %v440_v37 = vsel %vm1132_vm2, %v314_v41, %v364_v19  ;;  %v441_v51 = vsel %vm1156_vm3, %v329_v25, %v363_v17 }
  0xc3   : > { %v544_v0 = vadd.f32 %v528_v10, %v456_v27  ;;  %v490_v24 = vmul.f32 %v908_v46, %v426_v14  ;;  %v504_v20 = vmul.f32 %v465_v49, %v440_v37  ;;  %v505_v29 = vmul.f32 %v481_v34, %v441_v51 }
  0xc5   : > { %552 = vst [vmem:[%s1012_s22 + $0x30] sm:$0xff] %v544_v0  ;;  %v522_v7 = vcombine.low %v490_v24, %v491_v36  ;;  %v529_v5 = vcombine.low %v504_v20, %v505_v29 }
  0xc7   : > { %v538_v15 = vadd.f32 %v522_v7, %v923_v57  ;;  %v545_v60 = vadd.f32 %v529_v5, %v457_v58 }
  0xc9   : > { %546 = vst [vmem:[%s1012_s22] sm:$0xff] %v538_v15  ;;  %553 = vst [vmem:[%s1012_s22 + $0x38] sm:$0xff] %v545_v60 }
  0xca PF: > { %s13_s14 = sadd.s32 1, %s756_s14   ;;  %s1242_s12 = smov %s752_s13 }
  0xcb   : > { %p10_p5 = scmp.ge.s32.totalorder %s13_s14, 4   ;;  %s1243_s13 = smov %s1245_s15 }
  0xcd   :  { %12 = sbr.rel (!%p10_p5) target bundleno = 2 (0x2), region = 68 }

</bundles_post_ra>
